<compile_context>
chip_gen: v7x
topology: tpu7x:2x2x1
jax: 0.10.0
libtpu: 0.0.40
codegen_flags: <defaults>
</compile_context>

<pallas_src>
import jax
import jax.numpy as jnp
from jax.experimental import pallas as pl
from jax.experimental.pallas import tpu as pltpu

# ---------------------------------------------------------------------------
# Search-space token definitions (values from AutoGAN's search space).
# ---------------------------------------------------------------------------
CONV_TYPE = [0, 1]          # {'post', 'pre'}
NORM_TYPE = [0, 1, 2]       # {None, 'bn', 'in'}
UP_TYPE = [0, 1, 2]         # {'bilinear', 'nearest', 'deconv'}
SHORT_CUT_TYPE = [0, 1]     # {False, True}
SKIP_TYPE = [0, 1]          # {False, True}

LANE = 128                  # TPU lane width; decoder outputs padded to this.


# ---------------------------------------------------------------------------
# Fused rollout kernel: T LSTMCell steps + per-step decoder Linear.
# ---------------------------------------------------------------------------
def _controller_rollout_kernel(dec_idx_ref, ids_ref, use_x0_ref,      # SMEM
                               x0_ref, hx0_ref, cx0_ref, emb_ref,     # VMEM in
                               w_ref, b_ref, decw_ref, decb_ref,
                               logit_ref, hxo_ref, cxo_ref):          # outputs
    del dec_idx_ref  # only used by the decoder BlockSpec index_map
    step = pl.program_id(0)
    B, H = hx0_ref.shape

    # State lives in the hx/cx output blocks (constant index_map across the
    # step grid -> resident in VMEM, written back to HBM once at the end).
    @pl.when(step == 0)
    def _():
        hxo_ref[...] = hx0_ref[...]
        cxo_ref[...] = cx0_ref[...]

    hx = hxo_ref[...]
    cx = cxo_ref[...]

    # ---- step input: float x0 (step-0 style) or in-kernel embedding gather --
    rows = [emb_ref[pl.ds(ids_ref[step, b], 1), :] for b in range(B)]
    emb = jnp.concatenate(rows, axis=0)                       # [B, H]
    use_x0 = (use_x0_ref[step] == 1).astype(jnp.float32)      # scalar 0./1.
    x_in = use_x0 * x0_ref[...] + (1.0 - use_x0) * emb

    # ---- fused LSTMCell: single [B,2H]x[2H,4H] MXU matmul -------------------
    gates = (jnp.dot(jnp.concatenate([x_in, hx], axis=1), w_ref[...],
                     preferred_element_type=jnp.float32)
             + b_ref[...])                                     # [B, 4H]

    # Activation once on the full 4H (=128 lane) vreg: tanh on the g block
    # (PyTorch gate order i, f, g, o), sigmoid elsewhere.
    lane = jax.lax.broadcasted_iota(jnp.int32, gates.shape, 1)
    is_g = (lane >= 2 * H) & (lane < 3 * H)
    act = jnp.where(is_g, jnp.tanh(gates), jax.nn.sigmoid(gates))
    i_g = act[:, 0 * H:1 * H]
    f_g = act[:, 1 * H:2 * H]
    g_g = act[:, 2 * H:3 * H]
    o_g = act[:, 3 * H:4 * H]

    cx_new = f_g * cx + i_g * g_g
    hx_new = o_g * jnp.tanh(cx_new)
    hxo_ref[...] = hx_new
    cxo_ref[...] = cx_new

    # ---- decoder Linear (stacked decoders, selected via scalar prefetch) ---
    logit_ref[...] = (jnp.dot(hx_new, decw_ref[...],
                              preferred_element_type=jnp.float32)
                      + decb_ref[...])                         # [B, 128]


def _controller_rollout_impl(dec_idx, ids, use_x0, x0, hx, cx, emb, w, bias,
                             dec_w, dec_b):
    T = dec_idx.shape[0]
    B, H = hx.shape
    V = emb.shape[0]

    const2 = lambda i, *_: (0, 0)
    dec_map = lambda i, dec_idx_ref, ids_ref, flags_ref: (dec_idx_ref[i], 0, 0)

    grid_spec = pltpu.PrefetchScalarGridSpec(
        num_scalar_prefetch=3,                # dec_idx, ids, use_x0 -> SMEM
        grid=(T,),
        in_specs=[
            pl.BlockSpec((B, H), const2),              # x0 (resident)
            pl.BlockSpec((B, H), const2),              # hx0 (resident)
            pl.BlockSpec((B, H), const2),              # cx0 (resident)
            pl.BlockSpec((V, H), const2),              # embedding table
            pl.BlockSpec((2 * H, 4 * H), const2),      # fused LSTM weights
            pl.BlockSpec((1, 4 * H), const2),          # fused LSTM bias
            pl.BlockSpec((None, H, LANE), dec_map),    # decoder W for step i
            pl.BlockSpec((None, 1, LANE), dec_map),    # decoder b for step i
        ],
        out_specs=[
            pl.BlockSpec((None, B, LANE), lambda i, *_: (i, 0, 0)),  # logits
            pl.BlockSpec((B, H), const2),                            # hx_out
            pl.BlockSpec((B, H), const2),                            # cx_out
        ],
    )
    out_shape = (
        jax.ShapeDtypeStruct((T, B, LANE), jnp.float32),
        jax.ShapeDtypeStruct((B, H), jnp.float32),
        jax.ShapeDtypeStruct((B, H), jnp.float32),
    )
    return pl.pallas_call(
        _controller_rollout_kernel,
        grid_spec=grid_spec,
        out_shape=out_shape,
        compiler_params=pltpu.CompilerParams(
            dimension_semantics=("arbitrary",)),   # steps carry state: serial
    )(dec_idx, ids, use_x0, x0, hx, cx, emb, w, bias, dec_w, dec_b)


_controller_rollout = jax.jit(_controller_rollout_impl)


# ---------------------------------------------------------------------------
# Controller (parameters + forward) in JAX; hot path is the fused kernel.
# ---------------------------------------------------------------------------
class Controller:
    def __init__(self, hid_size, cur_stage, key):
        self.hid_size = hid_size
        self.cur_stage = cur_stage
        if cur_stage:
            self.tokens = [len(CONV_TYPE), len(NORM_TYPE), len(UP_TYPE),
                           len(SHORT_CUT_TYPE), len(SKIP_TYPE) ** cur_stage]
        else:
            self.tokens = [len(CONV_TYPE), len(NORM_TYPE), len(UP_TYPE),
                           len(SHORT_CUT_TYPE)]

        H = hid_size
        n_dec = len(self.tokens)
        ks = jax.random.split(key, 5 + 2 * n_dec)
        stdv = 1.0 / (H ** 0.5)

        # LSTMCell params (PyTorch layout [4H,H]/[4H]); store fused+transposed.
        w_ih = jax.random.uniform(ks[0], (4 * H, H), jnp.float32, -stdv, stdv)
        w_hh = jax.random.uniform(ks[1], (4 * H, H), jnp.float32, -stdv, stdv)
        b_ih = jax.random.uniform(ks[2], (4 * H,), jnp.float32, -stdv, stdv)
        b_hh = jax.random.uniform(ks[3], (4 * H,), jnp.float32, -stdv, stdv)
        # [embed | hx] @ W  with  W = [W_ih^T ; W_hh^T]  -> [2H, 4H]
        self.w_fused = jnp.concatenate([jnp.transpose(w_ih),
                                        jnp.transpose(w_hh)], axis=0)
        self.bias = (b_ih + b_hh).reshape(1, 4 * H)

        # Embedding: [sum(tokens), H], N(0,1) like nn.Embedding default.
        self.embedding = jax.random.normal(ks[4], (sum(self.tokens), H),
                                           jnp.float32)

        # Decoders: nn.Linear(H, token) each; stacked, padded to LANE outputs.
        dec_w, dec_b = [], []
        bound = 1.0 / (H ** 0.5)
        for d, token in enumerate(self.tokens):
            w = jax.random.uniform(ks[5 + 2 * d], (token, H), jnp.float32,
                                   -bound, bound)
            b = jax.random.uniform(ks[6 + 2 * d], (token,), jnp.float32,
                                   -bound, bound)
            dec_w.append(jnp.zeros((H, LANE), jnp.float32)
                         .at[:, :token].set(jnp.transpose(w)))
            dec_b.append(jnp.zeros((1, LANE), jnp.float32)
                         .at[:, :token].set(b))
        self.dec_w = jnp.stack(dec_w)      # [n_dec, H, LANE]
        self.dec_b = jnp.stack(dec_b)      # [n_dec, 1, LANE]

    def init_hidden(self, batch_size):
        z = jnp.zeros((batch_size, self.hid_size), jnp.float32)
        return z, z

    # ---- per-step forward, same semantics as the PyTorch module -----------
    def forward(self, x, hidden, index):
        """x: [B, H] float32 if index == 0 else [B] int32 token ids."""
        hx, cx = hidden
        B = hx.shape[0]
        if index == 0:
            x0 = x.astype(jnp.float32)
            ids = jnp.zeros((1, B), jnp.int32)
            flags = jnp.ones((1,), jnp.int32)
        else:
            x0 = jnp.zeros((B, self.hid_size), jnp.float32)
            ids = x.astype(jnp.int32).reshape(1, B)
            flags = jnp.zeros((1,), jnp.int32)
        dec_idx = jnp.full((1,), index, jnp.int32)
        logits, hx_new, cx_new = _controller_rollout(
            dec_idx, ids, flags, x0, hx, cx, self.embedding,
            self.w_fused, self.bias, self.dec_w, self.dec_b)
        # Slice the lane-padded logit BEFORE any softmax/sampling.
        return logits[0, :, :self.tokens[index]], (hx_new, cx_new)

    # ---- fused rollout: one pallas_call for all len(tokens) steps ----------
    def forward_rollout(self, x0, hidden, ids):
        """Teacher-forced fused rollout.

        x0:  [B, H] float input for step 0.
        ids: [T, B] int32 embedding indices for steps 1..T-1 (row 0 ignored).
        """
        # TODO(synk): the original sample() draws each step's token from the
        # previous step's softmax (multinomial) + critic; in-kernel sampling
        # is not implemented, so the fused path is teacher-forced.
        hx, cx = hidden
        T = len(self.tokens)
        dec_idx = jnp.arange(T, dtype=jnp.int32)
        flags = jnp.zeros((T,), jnp.int32).at[0].set(1)
        logits, hx_new, cx_new = _controller_rollout(
            dec_idx, ids.astype(jnp.int32), flags, x0.astype(jnp.float32),
            hx, cx, self.embedding, self.w_fused, self.bias,
            self.dec_w, self.dec_b)
        out = [logits[t, :, :tok] for t, tok in enumerate(self.tokens)]
        return out, (hx_new, cx_new)

    # ---- pure-JAX reference of the same forward math -----------------------
    def forward_ref(self, x, hidden, index):
        hx, cx = hidden
        H = self.hid_size
        if index == 0:
            embed = x.astype(jnp.float32)
        else:
            embed = jnp.take(self.embedding, x.astype(jnp.int32), axis=0)
        gates = jnp.concatenate([embed, hx], axis=1) @ self.w_fused + self.bias
        i_g = jax.nn.sigmoid(gates[:, 0 * H:1 * H])
        f_g = jax.nn.sigmoid(gates[:, 1 * H:2 * H])
        g_g = jnp.tanh(gates[:, 2 * H:3 * H])
        o_g = jax.nn.sigmoid(gates[:, 3 * H:4 * H])
        cx_new = f_g * cx + i_g * g_g
        hx_new = o_g * jnp.tanh(cx_new)
        logit = hx_new @ self.dec_w[index] + self.dec_b[index]
        return logit[:, :self.tokens[index]], (hx_new, cx_new)


if __name__ == "__main__":
    key = jax.random.PRNGKey(0)
    k_param, k_x, k_ids = jax.random.split(key, 3)

    HID_SIZE = 32
    BATCH = 2
    CUR_STAGE = 1

    ctrl = Controller(HID_SIZE, CUR_STAGE, k_param)
    T = len(ctrl.tokens)
    V = sum(ctrl.tokens)

    # --- per-step forward(): matches original per-step API -----------------
    x0 = jax.random.normal(k_x, (BATCH, HID_SIZE), jnp.float32)
    hidden0 = ctrl.init_hidden(BATCH)
    logit0, hidden1 = ctrl.forward(x0, hidden0, index=0)
    logit0 = jax.block_until_ready(logit0)

    x1 = jnp.array([0, 1], jnp.int32)     # action + sum(tokens[:0])
    logit1, hidden2 = ctrl.forward(x1, hidden1, index=1)
    logit1 = jax.block_until_ready(logit1)
    hidden2 = jax.tree_util.tree_map(jax.block_until_ready, hidden2)

    ref_hidden = ctrl.init_hidden(BATCH)
    r_logit0, ref_hidden = ctrl.forward_ref(x0, ref_hidden, 0)
    r_logit1, ref_hidden = ctrl.forward_ref(x1, ref_hidden, 1)
    assert logit0.shape == (BATCH, ctrl.tokens[0])
    assert logit1.shape == (BATCH, ctrl.tokens[1])
    assert jnp.allclose(logit0, r_logit0, rtol=1e-4, atol=1e-4)
    assert jnp.allclose(logit1, r_logit1, rtol=1e-4, atol=1e-4)
    assert jnp.allclose(hidden2[0], ref_hidden[0], rtol=1e-4, atol=1e-4)
    assert jnp.allclose(hidden2[1], ref_hidden[1], rtol=1e-4, atol=1e-4)

    # --- fused rollout: ONE pallas_call for all T steps ---------------------
    ids = jax.random.randint(k_ids, (T, BATCH), 0, V, jnp.int32)
    roll_logits, roll_hidden = ctrl.forward_rollout(
        x0, ctrl.init_hidden(BATCH), ids)
    roll_logits = [jax.block_until_ready(l) for l in roll_logits]
    roll_hidden = jax.tree_util.tree_map(jax.block_until_ready, roll_hidden)

    # Reference: replay the same teacher-forced sequence step by step.
    ref_h = ctrl.init_hidden(BATCH)
    ref_logits = []
    for t in range(T):
        xt = x0 if t == 0 else ids[t]
        lg, ref_h = ctrl.forward_ref(xt, ref_h, t)
        ref_logits.append(lg)
    for t in range(T):
        assert roll_logits[t].shape == (BATCH, ctrl.tokens[t])
        assert jnp.allclose(roll_logits[t], ref_logits[t],
                            rtol=1e-4, atol=1e-4)
    assert jnp.allclose(roll_hidden[0], ref_h[0], rtol=1e-4, atol=1e-4)
    assert jnp.allclose(roll_hidden[1], ref_h[1], rtol=1e-4, atol=1e-4)

    print("KERNEL_OK")
</pallas_src>

<mosaic_0001>
module attributes {stable_mosaic.version = 11 : i64} {
  func.func @_controller_rollout_kernel(%arg0: i32, %arg1: memref<1xi32, #tpu.memory_space<smem>>, %arg2: memref<1x2xi32, #tpu.memory_space<smem>>, %arg3: memref<1xi32, #tpu.memory_space<smem>>, %arg4: memref<2x32xf32, #tpu.memory_space<vmem>>, %arg5: memref<2x32xf32, #tpu.memory_space<vmem>>, %arg6: memref<2x32xf32, #tpu.memory_space<vmem>>, %arg7: memref<12x32xf32, #tpu.memory_space<vmem>>, %arg8: memref<64x128xf32, #tpu.memory_space<vmem>>, %arg9: memref<1x128xf32, #tpu.memory_space<vmem>>, %arg10: memref<1x32x128xf32, #tpu.memory_space<vmem>>, %arg11: memref<1x1x128xf32, #tpu.memory_space<vmem>>, %arg12: memref<1x2x128xf32, #tpu.memory_space<vmem>>, %arg13: memref<2x32xf32, #tpu.memory_space<vmem>>, %arg14: memref<2x32xf32, #tpu.memory_space<vmem>>) attributes {dimension_semantics = [#tpu.dimension_semantics<arbitrary>], iteration_bounds = array<i64: 1>, scalar_prefetch = 3 : i64, scratch_operands = 0 : i64, tpu.core_type = #tpu.core_type<tc>, window_params = [{pipeline_mode = #tpu.pipeline_mode<synchronous>, transform_indices = @transform_0, window_bounds = array<i64: 2, 32>}, {pipeline_mode = #tpu.pipeline_mode<synchronous>, transform_indices = @transform_1, window_bounds = array<i64: 2, 32>}, {pipeline_mode = #tpu.pipeline_mode<synchronous>, transform_indices = @transform_2, window_bounds = array<i64: 2, 32>}, {pipeline_mode = #tpu.pipeline_mode<synchronous>, transform_indices = @transform_3, window_bounds = array<i64: 12, 32>}, {pipeline_mode = #tpu.pipeline_mode<synchronous>, transform_indices = @transform_4, window_bounds = array<i64: 64, 128>}, {pipeline_mode = #tpu.pipeline_mode<synchronous>, transform_indices = @transform_5, window_bounds = array<i64: 1, 128>}, {transform_indices = @transform_6, window_bounds = array<i64: 1, 32, 128>}, {transform_indices = @transform_7, window_bounds = array<i64: 1, 1, 128>}, {transform_indices = @transform_8, window_bounds = array<i64: 1, 2, 128>}, {pipeline_mode = #tpu.pipeline_mode<synchronous>, transform_indices = @transform_9, window_bounds = array<i64: 2, 32>}, {pipeline_mode = #tpu.pipeline_mode<synchronous>, transform_indices = @transform_10, window_bounds = array<i64: 2, 32>}]} {
    %c0_i32 = arith.constant 0 : i32
    %0 = arith.cmpi eq, %arg0, %c0_i32 : i32
    %1 = arith.extui %0 : i1 to i32
    %c0_i32_0 = arith.constant 0 : i32
    %2 = arith.cmpi ne, %1, %c0_i32_0 : i32
    scf.if %2 {
      %c0_29 = arith.constant 0 : index
      %c0_30 = arith.constant 0 : index
      %66 = vector.load %arg5[%c0_29, %c0_30] : memref<2x32xf32, #tpu.memory_space<vmem>>, vector<2x32xf32>
      %c0_31 = arith.constant 0 : index
      %c0_32 = arith.constant 0 : index
      %67 = vector.load %arg13[%c0_31, %c0_32] : memref<2x32xf32, #tpu.memory_space<vmem>>, vector<2x32xf32>
      tpu.vector_store %arg13[%c0_31, %c0_32], %66 {strides = array<i32>} : memref<2x32xf32, #tpu.memory_space<vmem>>, vector<2x32xf32>,
      %c0_33 = arith.constant 0 : index
      %c0_34 = arith.constant 0 : index
      %68 = vector.load %arg6[%c0_33, %c0_34] : memref<2x32xf32, #tpu.memory_space<vmem>>, vector<2x32xf32>
      %c0_35 = arith.constant 0 : index
      %c0_36 = arith.constant 0 : index
      %69 = vector.load %arg14[%c0_35, %c0_36] : memref<2x32xf32, #tpu.memory_space<vmem>>, vector<2x32xf32>
      tpu.vector_store %arg14[%c0_35, %c0_36], %68 {strides = array<i32>} : memref<2x32xf32, #tpu.memory_space<vmem>>, vector<2x32xf32>,
    } else {
    }
    %c0 = arith.constant 0 : index
    %c0_1 = arith.constant 0 : index
    %3 = vector.load %arg13[%c0, %c0_1] : memref<2x32xf32, #tpu.memory_space<vmem>>, vector<2x32xf32>
    %c0_2 = arith.constant 0 : index
    %c0_3 = arith.constant 0 : index
    %4 = vector.load %arg14[%c0_2, %c0_3] : memref<2x32xf32, #tpu.memory_space<vmem>>, vector<2x32xf32>
    %5 = arith.index_cast %arg0 : i32 to index
    %c0_4 = arith.constant 0 : index
    %6 = memref.load %arg2[%5, %c0_4] : memref<1x2xi32, #tpu.memory_space<smem>>
    %7 = arith.index_cast %6 : i32 to index
    %c0_5 = arith.constant 0 : index
    %8 = vector.load %arg7[%7, %c0_5] : memref<12x32xf32, #tpu.memory_space<vmem>>, vector<1x32xf32>
    %9 = arith.index_cast %arg0 : i32 to index
    %c1 = arith.constant 1 : index
    %10 = memref.load %arg2[%9, %c1] : memref<1x2xi32, #tpu.memory_space<smem>>
    %11 = arith.index_cast %10 : i32 to index
    %c0_6 = arith.constant 0 : index
    %12 = vector.load %arg7[%11, %c0_6] : memref<12x32xf32, #tpu.memory_space<vmem>>, vector<1x32xf32>
    %13 = tpu.concatenate %8, %12 in 0 : vector<1x32xf32>, vector<1x32xf32> -> vector<2x32xf32>
    %14 = arith.index_cast %arg0 : i32 to index
    %15 = memref.load %arg3[%14] : memref<1xi32, #tpu.memory_space<smem>>
    %c1_i32 = arith.constant 1 : i32
    %16 = arith.cmpi eq, %15, %c1_i32 : i32
    %17 = arith.extui %16 : i1 to i32
    %18 = arith.sitofp %17 : i32 to f32
    %c0_7 = arith.constant 0 : index
    %c0_8 = arith.constant 0 : index
    %19 = vector.load %arg4[%c0_7, %c0_8] : memref<2x32xf32, #tpu.memory_space<vmem>>, vector<2x32xf32>
    %20 = vector.broadcast %18 : f32 to vector<2x32xf32>
    %21 = arith.mulf %20, %19 : vector<2x32xf32>
    %cst = arith.constant 1.000000e+00 : f32
    %22 = arith.subf %cst, %18 : f32
    %23 = vector.broadcast %22 : f32 to vector<2x32xf32>
    %24 = arith.mulf %23, %13 : vector<2x32xf32>
    %25 = arith.addf %21, %24 : vector<2x32xf32>
    %26 = tpu.concatenate %25, %3 in 1 : vector<2x32xf32>, vector<2x32xf32> -> vector<2x64xf32>
    %c0_9 = arith.constant 0 : index
    %c0_10 = arith.constant 0 : index
    %27 = vector.load %arg8[%c0_9, %c0_10] : memref<64x128xf32, #tpu.memory_space<vmem>>, vector<64x128xf32>
    %cst_11 = arith.constant dense<0.000000e+00> : vector<2x128xf32>
    %28 = tpu.matmul %26, %27, %cst_11 {dimension_numbers = #tpu.dot_dimension_numbers<[1], [0], [0], [1], [0, 0, 1, 1], [], []>} : vector<2x64xf32>, vector<64x128xf32>, vector<2x128xf32> -> vector<2x128xf32>
    %c0_12 = arith.constant 0 : index
    %c0_13 = arith.constant 0 : index
    %29 = vector.load %arg9[%c0_12, %c0_13] : memref<1x128xf32, #tpu.memory_space<vmem>>, vector<1x128xf32>
    %30 = vector.broadcast %29 : vector<1x128xf32> to vector<2x128xf32>
    %31 = arith.addf %28, %30 : vector<2x128xf32>
    %32 = tpu.iota {dimensions = array<i32: 1>} : vector<2x128xi32>
    %c64_i32 = arith.constant 64 : i32
    %33 = vector.broadcast %c64_i32 : i32 to vector<2x128xi32>
    %34 = arith.cmpi sge, %32, %33 : vector<2x128xi32>
    %c96_i32 = arith.constant 96 : i32
    %35 = vector.broadcast %c96_i32 : i32 to vector<2x128xi32>
    %36 = arith.cmpi slt, %32, %35 : vector<2x128xi32>
    %37 = arith.andi %34, %36 : vector<2x128xi1>
    %38 = math.tanh %31 : vector<2x128xf32>
    %39 = arith.negf %31 : vector<2x128xf32>
    %40 = math.exp %39 : vector<2x128xf32>
    %cst_14 = arith.constant 1.000000e+00 : f32
    %41 = vector.broadcast %cst_14 : f32 to vector<2x128xf32>
    %42 = arith.addf %41, %40 : vector<2x128xf32>
    %43 = arith.divf %41, %42 : vector<2x128xf32>
    %44 = arith.select %37, %38, %43 : vector<2x128xi1>, vector<2x128xf32>
    %45 = vector.extract_strided_slice %44 {offsets = [0, 0], sizes = [2, 32], strides = [1, 1]} : vector<2x128xf32> to vector<2x32xf32>
    %46 = vector.extract_strided_slice %44 {offsets = [0, 32], sizes = [2, 32], strides = [1, 1]} : vector<2x128xf32> to vector<2x32xf32>
    %47 = vector.extract_strided_slice %44 {offsets = [0, 64], sizes = [2, 32], strides = [1, 1]} : vector<2x128xf32> to vector<2x32xf32>
    %48 = vector.extract_strided_slice %44 {offsets = [0, 96], sizes = [2, 32], strides = [1, 1]} : vector<2x128xf32> to vector<2x32xf32>
    %49 = arith.mulf %46, %4 : vector<2x32xf32>
    %50 = arith.mulf %45, %47 : vector<2x32xf32>
    %51 = arith.addf %49, %50 : vector<2x32xf32>
    %52 = math.tanh %51 : vector<2x32xf32>
    %53 = arith.mulf %48, %52 : vector<2x32xf32>
    %c0_15 = arith.constant 0 : index
    %c0_16 = arith.constant 0 : index
    %54 = vector.load %arg13[%c0_15, %c0_16] : memref<2x32xf32, #tpu.memory_space<vmem>>, vector<2x32xf32>
    tpu.vector_store %arg13[%c0_15, %c0_16], %53 {strides = array<i32>} : memref<2x32xf32, #tpu.memory_space<vmem>>, vector<2x32xf32>,
    %c0_17 = arith.constant 0 : index
    %c0_18 = arith.constant 0 : index
    %55 = vector.load %arg14[%c0_17, %c0_18] : memref<2x32xf32, #tpu.memory_space<vmem>>, vector<2x32xf32>
    tpu.vector_store %arg14[%c0_17, %c0_18], %51 {strides = array<i32>} : memref<2x32xf32, #tpu.memory_space<vmem>>, vector<2x32xf32>,
    %c0_19 = arith.constant 0 : index
    %c0_20 = arith.constant 0 : index
    %c0_21 = arith.constant 0 : index
    %56 = vector.load %arg10[%c0_19, %c0_20, %c0_21] : memref<1x32x128xf32, #tpu.memory_space<vmem>>, vector<1x32x128xf32>
    %57 = vector.shape_cast %56 : vector<1x32x128xf32> to vector<32x128xf32>
    %cst_22 = arith.constant dense<0.000000e+00> : vector<2x128xf32>
    %58 = tpu.matmul %53, %57, %cst_22 {dimension_numbers = #tpu.dot_dimension_numbers<[1], [0], [0], [1], [0, 0, 1, 1], [], []>} : vector<2x32xf32>, vector<32x128xf32>, vector<2x128xf32> -> vector<2x128xf32>
    %c0_23 = arith.constant 0 : index
    %c0_24 = arith.constant 0 : index
    %c0_25 = arith.constant 0 : index
    %59 = vector.load %arg11[%c0_23, %c0_24, %c0_25] : memref<1x1x128xf32, #tpu.memory_space<vmem>>, vector<1x1x128xf32>
    %60 = vector.shape_cast %59 : vector<1x1x128xf32> to vector<1x128xf32>
    %61 = vector.broadcast %60 : vector<1x128xf32> to vector<2x128xf32>
    %62 = arith.addf %58, %61 : vector<2x128xf32>
    %c0_26 = arith.constant 0 : index
    %c0_27 = arith.constant 0 : index
    %c0_28 = arith.constant 0 : index
    %63 = vector.load %arg12[%c0_26, %c0_27, %c0_28] : memref<1x2x128xf32, #tpu.memory_space<vmem>>, vector<1x2x128xf32>
    %64 = vector.shape_cast %63 : vector<1x2x128xf32> to vector<2x128xf32>
    %65 = vector.shape_cast %62 : vector<2x128xf32> to vector<1x2x128xf32>
    tpu.vector_store %arg12[%c0_26, %c0_27, %c0_28], %65 {strides = array<i32>} : memref<1x2x128xf32, #tpu.memory_space<vmem>>, vector<1x2x128xf32>,
    return
  }
  func.func @transform_0(%arg0: i32, %arg1: memref<1xi32, #tpu.memory_space<smem>>, %arg2: memref<1x2xi32, #tpu.memory_space<smem>>, %arg3: memref<1xi32, #tpu.memory_space<smem>>) -> (i32, i32) {
    %c0_i32 = arith.constant 0 : i32
    %c0_i32_0 = arith.constant 0 : i32
    %c0_i32_1 = arith.constant 0 : i32
    return %c0_i32, %c0_i32_0 : i32, i32
  }
  func.func @transform_1(%arg0: i32, %arg1: memref<1xi32, #tpu.memory_space<smem>>, %arg2: memref<1x2xi32, #tpu.memory_space<smem>>, %arg3: memref<1xi32, #tpu.memory_space<smem>>) -> (i32, i32) {
    %c0_i32 = arith.constant 0 : i32
    %c0_i32_0 = arith.constant 0 : i32
    %c0_i32_1 = arith.constant 0 : i32
    return %c0_i32, %c0_i32_0 : i32, i32
  }
  func.func @transform_2(%arg0: i32, %arg1: memref<1xi32, #tpu.memory_space<smem>>, %arg2: memref<1x2xi32, #tpu.memory_space<smem>>, %arg3: memref<1xi32, #tpu.memory_space<smem>>) -> (i32, i32) {
    %c0_i32 = arith.constant 0 : i32
    %c0_i32_0 = arith.constant 0 : i32
    %c0_i32_1 = arith.constant 0 : i32
    return %c0_i32, %c0_i32_0 : i32, i32
  }
  func.func @transform_3(%arg0: i32, %arg1: memref<1xi32, #tpu.memory_space<smem>>, %arg2: memref<1x2xi32, #tpu.memory_space<smem>>, %arg3: memref<1xi32, #tpu.memory_space<smem>>) -> (i32, i32) {
    %c0_i32 = arith.constant 0 : i32
    %c0_i32_0 = arith.constant 0 : i32
    %c0_i32_1 = arith.constant 0 : i32
    return %c0_i32, %c0_i32_0 : i32, i32
  }
  func.func @transform_4(%arg0: i32, %arg1: memref<1xi32, #tpu.memory_space<smem>>, %arg2: memref<1x2xi32, #tpu.memory_space<smem>>, %arg3: memref<1xi32, #tpu.memory_space<smem>>) -> (i32, i32) {
    %c0_i32 = arith.constant 0 : i32
    %c0_i32_0 = arith.constant 0 : i32
    %c0_i32_1 = arith.constant 0 : i32
    return %c0_i32, %c0_i32_0 : i32, i32
  }
  func.func @transform_5(%arg0: i32, %arg1: memref<1xi32, #tpu.memory_space<smem>>, %arg2: memref<1x2xi32, #tpu.memory_space<smem>>, %arg3: memref<1xi32, #tpu.memory_space<smem>>) -> (i32, i32) {
    %c0_i32 = arith.constant 0 : i32
    %c0_i32_0 = arith.constant 0 : i32
    %c0_i32_1 = arith.constant 0 : i32
    return %c0_i32, %c0_i32_0 : i32, i32
  }
  func.func @transform_6(%arg0: i32, %arg1: memref<1xi32, #tpu.memory_space<smem>>, %arg2: memref<1x2xi32, #tpu.memory_space<smem>>, %arg3: memref<1xi32, #tpu.memory_space<smem>>) -> (i32, i32, i32) {
    %0 = arith.index_cast %arg0 : i32 to index
    %1 = memref.load %arg1[%0] : memref<1xi32, #tpu.memory_space<smem>>
    %c0_i32 = arith.constant 0 : i32
    %c0_i32_0 = arith.constant 0 : i32
    %c0_i32_1 = arith.constant 0 : i32
    return %1, %c0_i32, %c0_i32_0 : i32, i32, i32
  }
  func.func @transform_7(%arg0: i32, %arg1: memref<1xi32, #tpu.memory_space<smem>>, %arg2: memref<1x2xi32, #tpu.memory_space<smem>>, %arg3: memref<1xi32, #tpu.memory_space<smem>>) -> (i32, i32, i32) {
    %0 = arith.index_cast %arg0 : i32 to index
    %1 = memref.load %arg1[%0] : memref<1xi32, #tpu.memory_space<smem>>
    %c0_i32 = arith.constant 0 : i32
    %c0_i32_0 = arith.constant 0 : i32
    %c0_i32_1 = arith.constant 0 : i32
    return %1, %c0_i32, %c0_i32_0 : i32, i32, i32
  }
  func.func @transform_8(%arg0: i32, %arg1: memref<1xi32, #tpu.memory_space<smem>>, %arg2: memref<1x2xi32, #tpu.memory_space<smem>>, %arg3: memref<1xi32, #tpu.memory_space<smem>>) -> (i32, i32, i32) {
    %c0_i32 = arith.constant 0 : i32
    %c0_i32_0 = arith.constant 0 : i32
    %c0_i32_1 = arith.constant 0 : i32
    return %arg0, %c0_i32, %c0_i32_0 : i32, i32, i32
  }
  func.func @transform_9(%arg0: i32, %arg1: memref<1xi32, #tpu.memory_space<smem>>, %arg2: memref<1x2xi32, #tpu.memory_space<smem>>, %arg3: memref<1xi32, #tpu.memory_space<smem>>) -> (i32, i32) {
    %c0_i32 = arith.constant 0 : i32
    %c0_i32_0 = arith.constant 0 : i32
    %c0_i32_1 = arith.constant 0 : i32
    return %c0_i32, %c0_i32_0 : i32, i32
  }
  func.func @transform_10(%arg0: i32, %arg1: memref<1xi32, #tpu.memory_space<smem>>, %arg2: memref<1x2xi32, #tpu.memory_space<smem>>, %arg3: memref<1xi32, #tpu.memory_space<smem>>) -> (i32, i32) {
    %c0_i32 = arith.constant 0 : i32
    %c0_i32_0 = arith.constant 0 : i32
    %c0_i32_1 = arith.constant 0 : i32
    return %c0_i32, %c0_i32_0 : i32, i32
  }
}

</mosaic_0001>

<bundles_post_ra>
// kernel: _controller_rollout_impl.1
= control target key start
LH: loop header
LB: loop body
LE: loop exit
PB: predicated region body
PF: predicated region fallthrough
CT: control target
= control target key end

     0   :  { %s970_s0 = inlined_call_operand.<no memory space> [shape: s32[1], index: 0, kind: input, shape index: {}]   ;;  %s971_s1 = inlined_call_operand.vmem [shape: s32[1,2], index: 1, kind: input, shape index: {}]   ;;  %s972_s2 = inlined_call_operand.<no memory space> [shape: s32[1], index: 2, kind: input, shape index: {}]   ;;  %s973_s3 = inlined_call_operand.hbm [shape: f32[2,32], index: 3, kind: input, shape index: {}]   ;;  %s974_s4 = inlined_call_operand.hbm [shape: f32[2,32], index: 4, kind: input, shape index: {}]   ;;  %s975_s5 = inlined_call_operand.hbm [shape: f32[2,32], index: 5, kind: input, shape index: {}]   ;;  %s976_s6 = inlined_call_operand.vmem [shape: f32[12,32], index: 6, kind: input, shape index: {}]   ;;  %s977_s7 = inlined_call_operand.hbm [shape: f32[64,128], index: 7, kind: input, shape index: {}]   ;;  %s978_s8 = inlined_call_operand.vmem [shape: f32[1,128], index: 8, kind: input, shape index: {}]   ;;  %s979_s9 = inlined_call_operand.hbm [shape: f32[5,32,128], index: 9, kind: input, shape index: {}]   ;;  %s980_s10 = inlined_call_operand.vmem [shape: f32[5,1,128], index: 10, kind: input, shape index: {}]   ;;  %s981_s11 = inlined_call_operand.hbm [shape: f32[1,2,128], index: 11, kind: output, shape index: {0}]   ;;  %s982_s12 = inlined_call_operand.hbm [shape: f32[2,32], index: 12, kind: output, shape index: {1}]   ;;  %s983_s13 = inlined_call_operand.hbm [shape: f32[2,32], index: 13, kind: output, shape index: {2}]  }
   0x1   :  { %s20_s27 = sshll.u32 %s971_s1, 4  ;;  %s21_s27 = int_to_ptr.vmem [resolvable:$true] %s20_s27 }
   0x2   :  { %s532_s28 = scalar_lea.vmem %s21_s27, 16  ;;  %p537_p1 = scmp.lt.s32.totalorder %s21_s27, %s21_s27 }
   0x3   :  { %p533_p0 = scmp.ne.s32.totalorder %s21_s27, %s532_s28  ;;  %p538_p2 = scmp.lt.s32.totalorder %s532_s28, %s532_s28 }
   0x5   :  { %p539_p3 = por %p538_p2, %p537_p1 }
   0x7   :  { %p540_p4 = pnand %p539_p3, %p533_p0 }
   0x9   :  { %543 = shalt.err (!%p540_p4)  }
   0xa   :  { %s734_s29 = smov [#allocation4]  }
   0xb   :  { %23 = dma.vmem_to_smem %s21_s27, 16, %s734_s29, [#allocation2] }
   0xc   :  { %722 = dma.done.wait [#allocation2], 16 }
   0xd   :  { %723 = vsyncadd [#allocation2], 4294967280 }
   0xe   :  { %26 = sfence }
   0xf   :  { %27 = vsyncpa [#allocation7], 0 }
  0x10   :  { %28 = vsyncpa [#allocation10], 0 }
  0x11   :  { %29 = vsyncpa [#allocation13], 0 }
  0x12   :  { %30 = vsyncpa [#allocation8], 0 }
  0x13   :  { %31 = vsyncpa [#allocation17], 0  ;;  %s735_s30 = smov [#allocation9]   ;;  %s736_s14 = smov [#allocation12]  }
  0x14   :  { %s48_s1 = sshll.u32 %s735_s30, 4  ;;  %s69_s15 = sshll.u32 %s736_s14, 4  ;;  %s49_s1 = int_to_ptr.vmem [resolvable:$true] %s48_s1  ;;  %s824_s15 = int_to_ptr.vmem [resolvable:$true] %s69_s15 }
  0x15   :  { %s544_s18 = scalar_lea.hbm %s974_s4, 32 }
  0x16   :  { %p545_p5 = scmp.ne.s32.totalorder %s974_s4, %s544_s18  ;;  %p548_p6 = scmp.lt.u32.totalorder %s544_s18, %s974_s4 }
  0x18   :  { %p550_p7 = pnand %p548_p6, %p545_p5 }
  0x1a   :  { %553 = shalt.err (!%p550_p7)
}
  0x1b   :  { %s554_s23 = scalar_lea.vmem %s49_s1, 32  ;;  %p559_p9 = scmp.lt.s32.totalorder %s49_s1, %s49_s1 }
  0x1c   :  { %p555_p8 = scmp.ne.s32.totalorder %s49_s1, %s554_s23  ;;  %p560_p10 = scmp.lt.s32.totalorder %s554_s23, %s554_s23 }
  0x1e   :  { %p561_p11 = por %p560_p10, %p559_p9 }
  0x20   :  { %p562_p12 = pnand %p561_p11, %p555_p8 }
  0x22   :  { %565 = shalt.err (!%p562_p12)
}
  0x23   :  { %51 = dma.hbm_to_vmem [thread:$0]  %s974_s4, 32, %s49_s1, [#allocation10]  }
  0x24   :  { %s566_s28 = scalar_lea.hbm %s977_s7, 1024 }
  0x25   :  { %p567_p13 = scmp.ne.s32.totalorder %s977_s7, %s566_s28  ;;  %p570_p0 = scmp.lt.u32.totalorder %s566_s28, %s977_s7 }
  0x27   :  { %p572_p1 = pnand %p570_p0, %p567_p13 }
  0x29   :  { %575 = shalt.err (!%p572_p1)
}
  0x2a   :  { %s576_s17 = scalar_lea.vmem %s824_s15, 1024  ;;  %p581_p3 = scmp.lt.s32.totalorder %s824_s15, %s824_s15 }
  0x2b   :  { %p577_p2 = scmp.ne.s32.totalorder %s824_s15, %s576_s17  ;;  %p582_p4 = scmp.lt.s32.totalorder %s576_s17, %s576_s17 }
  0x2d   :  { %p583_p5 = por %p582_p4, %p581_p3 }
  0x2f   :  { %p584_p6 = pnand %p583_p5, %p577_p2 }
  0x31   :  { %587 = shalt.err (!%p584_p6)
}
  0x32   :  { %s737_s4 = smov 128   ;;  %s738_s1 = smov 8  }
  0x33   :  { %75 = dma.hbm_to_vmem [thread:$0]  %s977_s7, 1024, %s824_s15, [#allocation13], %s737_s4, %s737_s4, %s738_s1  }
  0x34   :  { %s739_s20 = smov [#allocation6]   ;;  %s740_s22 = smov [#allocation11]  }
  0x35   :  { %s38_s21 = sshll.u32 %s739_s20, 4  ;;  %s58_s23 = sshll.u32 %s740_s22, 4  ;;  %s39_s21 = int_to_ptr.vmem [resolvable:$true] %s38_s21  ;;  %s59_s23 = int_to_ptr.vmem [resolvable:$true] %s58_s23 }
  0x36   :  { %s588_s26 = scalar_lea.hbm %s973_s3, 32 }
  0x37   :  { %p589_p7 = scmp.ne.s32.totalorder %s973_s3, %s588_s26  ;;  %p592_p8 = scmp.lt.u32.totalorder %s588_s26, %s973_s3 }
  0x39   :  { %p594_p9 = pnand %p592_p8, %p589_p7 }
  0x3b   :  { %597 = shalt.err (!%p594_p9)
}
  0x3c   :  { %s598_s7 = scalar_lea.vmem %s39_s21, 32  ;;  %p603_p11 = scmp.lt.s32.totalorder %s39_s21, %s39_s21 }
  0x3d   :  { %p599_p10 = scmp.ne.s32.totalorder %s39_s21, %s598_s7  ;;  %p604_p12 = scmp.lt.s32.totalorder %s598_s7, %s598_s7 }
  0x3f   :  { %p605_p13 = por %p604_p12, %p603_p11 }
  0x41   :  { %p606_p0 = pnand %p605_p13, %p599_p10 }
  0x43   :  { %609 = shalt.err (!%p606_p0)
}
  0x44   :  { %41 = dma.hbm_to_vmem [thread:$0]  %s973_s3, 32, %s39_s21, [#allocation7]  }
  0x45   :  { %s610_s18 = scalar_lea.hbm %s975_s5, 32 }
  0x46   :  { %p611_p1 = scmp.ne.s32.totalorder %s975_s5, %s610_s18  ;;  %p614_p2 = scmp.lt.u32.totalorder %s610_s18, %s975_s5 }
  0x48   :  { %p616_p3 = pnand %p614_p2, %p611_p1 }
  0x4a   :  { %619 = shalt.err (!%p616_p3)
}
  0x4b   :  { %s620_s25 = scalar_lea.vmem %s59_s23, 32  ;;  %p625_p5 = scmp.lt.s32.totalorder %s59_s23, %s59_s23 }
  0x4c   :  { %p621_p4 = scmp.ne.s32.totalorder %s59_s23, %s620_s25  ;;  %p626_p6 = scmp.lt.s32.totalorder %s620_s25, %s620_s25 }
  0x4e   :  { %p627_p7 = por %p626_p6, %p625_p5 }
  0x50   :  { %p628_p8 = pnand %p627_p7, %p621_p4 }
  0x52   :  { %631 = shalt.err (!%p628_p8)
}
  0x53   :  { %61 = dma.hbm_to_vmem [thread:$0]  %s975_s5, 32, %s59_s23, [#allocation10]  }
  0x54   :  { %s444_s28 = sshll.u32 %s970_s0, 9  ;;  %s741_s15 = smov [#allocation14]  }
  0x55   :  { %s86_s7 = scalar_lea.hbm %s979_s9, %s444_s28  ;;  %s87_s14 = sshll.u32 %s741_s15, 4  ;;  %s88_s14 = int_to_ptr.vmem [resolvable:$true] %s87_s14 }
  0x56   :  { %s632_s16 = scalar_lea.hbm %s86_s7, 512  ;;  %s634_s19 = scalar_lea.hbm %s979_s9, 2560 }
  0x57   :  { %p633_p9 = scmp.ne.s32.totalorder %s86_s7, %s632_s16  ;;  %p635_p10 = scmp.lt.u32.totalorder %s86_s7, %s979_s9 }
  0x58   :  { %p636_p11 = scmp.lt.u32.totalorder %s634_s19, %s632_s16  ;;  %p638_p13 = scmp.lt.u32.totalorder %s632_s16, %s86_s7 }
  0x5a   :  { %p637_p12 = por %p636_p11, %p635_p10 }
  0x5c   :  { %p639_p0 = por %p638_p13, %p637_p12 }
  0x5e   :  { %p640_p1 = pnand %p639_p0, %p633_p9 }
  0x60   :  { %643 = shalt.err (!%p640_p1)
}
  0x61   :  { %s644_s5 = scalar_lea.vmem %s88_s14, 512  ;;  %p649_p3 = scmp.lt.s32.totalorder %s88_s14, %s88_s14 }
  0x62   :  { %p645_p2 = scmp.ne.s32.totalorder %s88_s14, %s644_s5  ;;  %p650_p4 = scmp.lt.s32.totalorder %s644_s5, %s644_s5 }
  0x64   :  { %p651_p5 = por %p650_p4, %p649_p3 }
  0x66   :  { %p652_p6 = pnand %p651_p5, %p645_p2 }
  0x68   :  { %655 = shalt.err (!%p652_p6)
}
  0x69   :  { %93 = dma.hbm_to_vmem [thread:$0]  %s86_s7, 512, %s88_s14, [#allocation13], %s737_s4, %s737_s4, %s738_s1  }
  0x6a   :  { %724 = dma.done.wait [#allocation7], 32  }
  0x6b   :  { %725 = vsyncadd [#allocation7], 4294967264 }
  0x6c   :  { %726 = dma.done.wait [#allocation10], 64  }
  0x6d   :  { %727 = vsyncadd [#allocation10], 4294967232 }
  0x6e   :  { %728 = dma.done.wait [#allocation13], 1536  }
  0x6f   :  { %729 = vsyncadd [#allocation13], 4294965760  ;;  %v742_v0 = vmov 0.0|0.0   ;;  %vm743_vm0 = vmmov 0   ;;  %v744_v1 = vmov 0.0   ;;  %vm131_vm1 = vcmask 254976  }
  0x70   :  { %489 = vmatprep.subr.bf16.mxu0 %v742_v0  ;;  %501 = vmatprep.subr.bf16.mxu1 %v742_v0  ;;  %v130_v2 = vld [vmem:[#allocation9] sm:$0x3]  ;;  %v167_v3 = vld [vmem:[#allocation12] sm:$0xff]  ;;  %v168_v4 = vld [vmem:[#allocation12 + $0x8] sm:$0xff]  ;;  %s745_s9 = smov 32   ;;  %s438_s4 = sld [smem:[#allocation4 + $0x1]]  ;;  %v256_v36 = vlaneseq }
  0x71   :  { %475 = vmatprep.mubr.msk.f32.mxu0 %vm743_vm0, %v744_v1  ;;  %486 = vmatprep.mubr.msk.f32.mxu1 %vm743_vm0, %v744_v1  ;;  %132 = vst.msk [vmem:[#allocation16] sm:$0x3] %vm131_vm1, %v130_v2  ;;  %v490_v5 = vpack.c.bf16 %v168_v4, %v167_v3  ;;  %v169_v6 = vld [vmem:[#allocation12 + $0x10] sm:$0xff]  ;;  %v170_v7 = vld [vmem:[#allocation12 + $0x18] sm:$0xff]  ;;  %v171_v9 = vld [vmem:[#allocation12 + $0x20] sm:$0xff]  ;;  %p151_p7 = scmp.eq.s32.totalorder %s972_s2, 1 }
  0x72   :  { %v493_v8 = vpack.c.bf16 %v170_v7, %v169_v6  ;;  %v172_v10 = vld [vmem:[#allocation12 + $0x28] sm:$0xff]  ;;  %v133_v11 = vld [vmem:[#allocation11] sm:$0x3]  ;;  %v173_v14 = vld [vmem:[#allocation12 + $0x30] sm:$0xff]  ;;  %s138_s24 = sld [smem:[#allocation4]]  ;;  %vm148_vm2 = vcmask 1040384  }
  0x73   :  { %491 = vmatpush3.bf16.msra.mxu0 %v490_v5  ;;  %134 = vst.msk [vmem:[#allocation18] sm:$0x3] %vm131_vm1, %v133_v11  ;;  %v496_v12 = vpack.c.bf16 %v172_v10, %v171_v9  ;;  %v174_v15 = vld [vmem:[#allocation12 + $0x38] sm:$0xff]  ;;  %s152_s25 = scalar_select %p151_p7, 1, 0  ;;  %vm165_vm3 = vcmask 261120  }
  0x74   :  { %492 = vmatprep.subr.bf16.mxu0 %v742_v0  ;;  %v499_v16 = vpack.c.bf16 %v174_v15, %v173_v14  ;;  %v154_v22 = vld [vmem:[#allocation6] sm:$0x3]  ;;  %vm182_vm4 = vcmask 523264   ;;  %v257_v38 = vand.u32 127, %v256_v36  ;;  %v301_v48 = vld [vmem:[#allocation14] sm:$0xff]  ;;  %v302_v49 = vld [vmem:[#allocation14 + $0x8] sm:$0xff] }
  0x75   :  { %s153_s27 = scvt.s32.f32 %s152_s25  ;;  %v439_v30 = vld [vmem:[%s978_s8] ss:$0 sm:$0xff]  ;;  %v303_v50 = vld [vmem:[#allocation14 + $0x10] sm:$0xff]  ;;  %v502_v51 = vpack.c.bf16 %v302_v49, %v301_v48  ;;  %s747_s8 = smov 96  }
  0x76   :  { %s143_s26 = scalar_lea.vmem %s976_s6, %s438_s4  ;;  %vm258_vm5 = vcmp.ge.s32.totalorder %v257_v38, 64  ;;  %vm259_vm6 = vcmp.lt.s32.totalorder %v257_v38, 96  ;;  %v304_v52 = vld [vmem:[#allocation14 + $0x18] sm:$0xff]  ;;  %s748_s14 = smov [#allocation16]  }
  0x77   :  { %494 = vmatpush3.bf16.msra.mxu0 %v493_v8  ;;  %v144_v18 = vld [vmem:[%s143_s26] sm:$0x1]  ;;  %s157_s7 = ssub.f32 1.0, %s153_s27  ;;  %v155_v23 = vstv %s153_s27  ;;  %vm260_vm7 = vmand %vm258_vm5, %vm259_vm6  ;;  %503 = vmatpush3.bf16.msra.mxu1 %v502_v51  ;;  %v505_v53 = vpack.c.bf16 %v304_v52, %v303_v50  ;;  %s401_s16 = sshll.u32 %s748_s14, 4  ;;  %s402_s16 = int_to_ptr.vmem [resolvable:$true] %s401_s16 }
  0x78   :  { %v135_v13 = vld [vmem:[#allocation16] sm:$0x3]  ;;  %495 = vmatprep.subr.bf16.mxu0 %v742_v0  ;;  %s139_s30 = scalar_lea.vmem %s976_s6, %s138_s24  ;;  %v146_v19 = vrot.slane %v144_v18, 7  ;;  %v156_v25 = vmul.f32 %v155_v23, %v154_v22  ;;  %s746_s6 = smov 64   ;;  %504 = vmatprep.subr.bf16.mxu1 %v742_v0 }
  0x79   :  { %162 = vrot.lane.b32.xlu0 %v135_v13, %s745_s9  ;;  %v140_v20 = vld [vmem:[%s139_s30] sm:$0x1]  ;;  %v158_v24 = vstv %s157_s7  ;;  %s656_s17 = scalar_lea.vmem %s402_s16, 32  ;;  %p661_p9 = scmp.lt.s32.totalorder %s402_s16, %s402_s16 }
  0x7a   :  { %v136_v17 = vld [vmem:[#allocation18] sm:$0x3]  ;;  %v149_v21 = vsel %vm148_vm2, %v140_v20, %v146_v19  ;;  %p657_p8 = scmp.ne.s32.totalorder %s402_s16, %s656_s17  ;;  %p662_p10 = scmp.lt.s32.totalorder %s656_s17, %s656_s17 }
  0x7b   :  { %497 = vmatpush3.bf16.msra.mxu0 %v496_v12  ;;  %270 = vrot.lane.b32.xlu1 %v136_v17, %s745_s9  ;;  %v159_v26 = vmul.f32 %v158_v24, %v149_v21 }
  0x7c   :  { %498 = vmatprep.subr.bf16.mxu0 %v742_v0  ;;  %506 = vmatpush3.bf16.msra.mxu1 %v505_v53  ;;  %p663_p11 = por %p662_p10, %p661_p9 }
  0x7d   :  { %v160_v27 = vadd.f32 %v159_v26, %v156_v25 }
  0x7e   :  { %p664_p12 = pnand %p663_p11, %p657_p8 }
  0x7f   :  { %500 = vmatpush3.bf16.msra.mxu0 %v499_v16 }
  0xeb   :  { %v163_v28 = vpop.permute.xlu0 %162 }
  0xec   :  { %v166_v29 = vsel %vm165_vm3, %v160_v27, %v163_v28 }
  0xed   :  { %476 = vmatmul.mubr.msk.f32.vlgmr.msra.gmra.mrb[0].mxu0 %vm182_vm4, %v166_v29  ;;  %v271_v44 = vpop.permute.xlu1 %270 }
 0x1c0   :  { %v252_v31 = vpop.f32.mrb[0].mxu0 }
 0x1c1   :  { %v253_v32 = vadd.f32 %v439_v30, %v252_v31  ;;  %v477_v33 = vpop.f32.mrb[1].mxu0 }
 0x1c3   :  { %v441_v34 = vmul.f32 -1.442695, %v253_v32 }
 0x1c5   :  { %524 = vpow2.f32 %v441_v34 }
 0x1c6   :  { %526 = vtanh.f32 %v253_v32 }
 0x1cf   :  { %v525_v35 = vpop.eup %524 }
 0x1d0   :  { %v265_v37 = vadd.f32 1.0, %v525_v35  ;;  %v527_v39 = vpop.eup %526 }
 0x1d2   :  { %528 = vrcp.f32 %v265_v37 }
 0x1dc   :  { %v529_v40 = vpop.eup %528 }
 0x1dd   :  { %v268_v41 = vsel %vm260_vm7, %v527_v39, %v529_v40 }
 0x1de   :  { %275 = vrot.lane.b32.xlu0 %v268_v41, %s746_s6  ;;  %v273_v45 = vmul.f32 %v271_v44, %v268_v41 }
 0x250   :  { %v276_v42 = vpop.permute.xlu0 %275 }
 0x251   :  { %v278_v43 = vmul.f32 %v276_v42, %v268_v41 }
 0x253   :  { %280 = vrot.lane.b32.xlu1 %v278_v43, %s745_s9 }
 0x2c5   :  { %v281_v46 = vpop.permute.xlu1 %280 }
 0x2c6   :  { %v283_v47 = vadd.f32 %v281_v46, %v273_v45 }
 0x2c8   :  { %530 = vtanh.f32 %v283_v47 }
 0x2d2   :  { %v531_v54 = vpop.eup %530 }
 0x2d3   :  { %286 = vrot.lane.b32.xlu0 %v531_v54, %s746_s6 }
 0x2d7   :  { %297 = vrot.lane.b32.xlu0 %v283_v47, %s747_s8 }
 0x345   :  { %v287_v55 = vpop.permute.xlu0 %286 }
 0x346   :  { %v289_v56 = vmul.f32 %v287_v55, %v268_v41 }
 0x348   :  { %291 = vrot.lane.b32.xlu1 %v289_v56, %s745_s9 }
 0x349   :  { %v298_v57 = vpop.permute.xlu0 %297 }
 0x34a   :  { %300 = vst.msk [vmem:[#allocation18] sm:$0x3] %vm131_vm1, %v298_v57 }
 0x3ba   :  { %v292_v58 = vpop.permute.xlu1 %291 }
 0x3bb   :  { %295 = vst.msk [vmem:[#allocation16] sm:$0x3] %vm131_vm1, %v292_v58  ;;  %487 = vmatmul.mubr.msk.f32.vlgmr.msra.gmra.mrb[0].mxu1 %vm165_vm3, %v292_v58 }
 0x3bc   :  { %667 = shalt.err (!%p664_p12)
}
 0x3bd   :  { %s668_s20 = scalar_lea.hbm %s982_s12, 32 }
 0x3be   :  { %p669_p13 = scmp.ne.s32.totalorder %s982_s12, %s668_s20  ;;  %p672_p0 = scmp.lt.u32.totalorder %s668_s20, %s982_s12 }
 0x3c0   :  { %p674_p1 = pnand %p672_p0, %p669_p13 }
 0x3c2   :  { %677 = shalt.err (!%p674_p1)
}
 0x3c3   :  { %404 = dma.vmem_to_hbm [thread:$0]  %s402_s16, 32, %s982_s12, [#allocation17]  }
 0x3c4   :  { %s749_s24 = smov [#allocation18]  }
 0x3c5   :  { %s411_s25 = sshll.u32 %s749_s24, 4  ;;  %s412_s25 = int_to_ptr.vmem [resolvable:$true] %s411_s25 }
 0x3c6   :  { %s678_s3 = scalar_lea.vmem %s412_s25, 32  ;;  %p683_p3 = scmp.lt.s32.totalorder %s412_s25, %s412_s25 }
 0x3c7   :  { %p679_p2 = scmp.ne.s32.totalorder %s412_s25, %s678_s3  ;;  %p684_p4 = scmp.lt.s32.totalorder %s678_s3, %s678_s3 }
 0x3c9   :  { %p685_p5 = por %p684_p4, %p683_p3 }
 0x3cb   :  { %p686_p6 = pnand %p685_p5, %p679_p2 }
 0x3cd   :  { %689 = shalt.err (!%p686_p6)
}
 0x3ce   :  { %s690_s27 = scalar_lea.hbm %s983_s13, 32 }
 0x3cf   :  { %p691_p7 = scmp.ne.s32.totalorder %s983_s13, %s690_s27  ;;  %p694_p8 = scmp.lt.u32.totalorder %s690_s27, %s983_s13 }
 0x3d1   :  { %p696_p9 = pnand %p694_p8, %p691_p7 }
 0x3d3   :  { %699 = shalt.err (!%p696_p9)
}
 0x3d4   :  { %414 = dma.vmem_to_hbm [thread:$0]  %s412_s25, 32, %s983_s13, [#allocation17]  }
 0x3d5   :  { %p122_p10 = scmp.lt.s32.totalorder %s970_s0, 4  ;;  %s750_s19 = smov [#allocation15]  }
 0x3d6   :  { %s391_s20 = sshll.u32 %s750_s19, 4  ;;  %s392_s20 = int_to_ptr.vmem [resolvable:$true] %s391_s20 }
 0x3d7   :  { %s985_s0 = smov (!%p122_p10, %s970_s0), 4  ;;  %s700_s13 = scalar_lea.vmem %s392_s20, 32 }
 0x3d8   :  { %s124_s18 = scalar_lea.vmem %s980_s10, %s985_s0  ;;  %p701_p11 = scmp.ne.s32.totalorder %s392_s20, %s700_s13 }
 0x3d9   :  { %v442_v59 = vld [vmem:[%s124_s18] ss:$0 sm:$0xff]  ;;  %p705_p12 = scmp.lt.s32.totalorder %s392_s20, %s392_s20  ;;  %p706_p13 = scmp.lt.s32.totalorder %s700_s13, %s700_s13 }
 0x3db   :  { %p707_p0 = por %p706_p13, %p705_p12 }
 0x3dd   :  { %p708_p1 = pnand %p707_p0, %p701_p11 }
 0x48e   :  { %v380_v60 = vpop.f32.mrb[0].mxu1 }
 0x48f   :  { %v381_v61 = vadd.f32 %v442_v59, %v380_v60  ;;  %v488_v62 = vpop.f32.mrb[1].mxu1 }
 0x491   :  { %384 = vst [vmem:[#allocation15] sm:$0x3] %v381_v61 }
 0x492   :  { %711 = shalt.err (!%p708_p1)
}
 0x493   :  { %s712_s9 = scalar_lea.hbm %s981_s11, 32 }
 0x494   :  { %p713_p2 = scmp.ne.s32.totalorder %s981_s11, %s712_s9  ;;  %p716_p3 = scmp.lt.u32.totalorder %s712_s9, %s981_s11 }
 0x496   :  { %p718_p4 = pnand %p716_p3, %p713_p2 }
 0x498   :  { %721 = shalt.err (!%p718_p4)
}
 0x499   :  { %394 = dma.vmem_to_hbm [thread:$0]  %s392_s20, 32, %s981_s11, [#allocation8]  }
 0x49a   :  { %730 = dma.done.wait [#allocation8], 32  }
 0x49b   :  { %731 = vsyncadd [#allocation8], 4294967264 }
 0x49c   :  { %732 = dma.done.wait [#allocation17], 64  }
 0x49d   :  { %733 = vsyncadd [#allocation17], 4294967232 }
 0x49e   :  { %424 = vsyncpa [#allocation7], 1 }
 0x49f   :  { %425 = vsyncpa [#allocation10], 1 }
 0x4a0   :  { %426 = vsyncpa [#allocation13], 1 }
 0x4a1   :  { %427 = vsyncpa [#allocation8], 1 }
 0x4a2   :  { %428 = vsyncpa [#allocation17], 1 }

</bundles_post_ra>
